<compile_context>
chip_gen: v7x
topology: tpu7x:2x2x1
jax: 0.10.0
libtpu: 0.0.40
codegen_flags: <defaults>
</compile_context>

<pallas_src>
import functools

import jax
import jax.numpy as jnp
from jax import lax
from jax.experimental import pallas as pl
from jax.experimental.pallas import tpu as pltpu

P_DROP = 0.1
WIDTH = 512                      # lane-dense slab width (multiple of 128)
TARGET_BLOCK_BYTES = 4 * 1024 * 1024


def _dropout_kernel(seed_ref, x_ref, o_ref, *, block_rows, width,
                    threshold31, scale):
    # Global element index for this block (counter for the hash).
    i = pl.program_id(0)
    shape = x_ref.shape
    row = lax.broadcasted_iota(jnp.int32, shape, 0)
    col = lax.broadcasted_iota(jnp.int32, shape, 1)
    gidx = (i * block_rows + row) * width + col          # unique per element

    # Counter-based PRNG: fold in the seed, then murmur3 fmix32 finalizer.
    h = gidx.astype(jnp.uint32)
    key = seed_ref[0].astype(jnp.uint32)
    h = h + key * jnp.uint32(0x9E3779B9)
    h = h ^ (h >> jnp.uint32(16))
    h = h * jnp.uint32(0x85EBCA6B)
    h = h ^ (h >> jnp.uint32(13))
    h = h * jnp.uint32(0xC2B2AE35)
    h = h ^ (h >> jnp.uint32(16))

    # keep iff top 31 random bits >= p * 2^31   =>   P(keep) = 1 - p
    r = (h >> jnp.uint32(1)).astype(jnp.int32)           # uniform in [0, 2^31)
    keep = r >= jnp.int32(threshold31)

    # Fused mask + scale in f32, cast once at the end.
    xv = x_ref[...].astype(jnp.float32)
    kf = keep.astype(jnp.float32) * jnp.float32(scale)
    o_ref[...] = (xv * kf).astype(o_ref.dtype)


def dropout_pallas(x, seed, p=P_DROP, *, width=WIDTH,
                   target_block_bytes=TARGET_BLOCK_BYTES):
    """Training-mode inverted dropout on an arbitrarily shaped array."""
    if p <= 0.0:
        return x

    orig_shape = x.shape
    total = x.size
    dtype = x.dtype
    itemsize = jnp.dtype(dtype).itemsize
    # Sublane pack factor: f32 -> 8, bf16 -> 16, int8/fp8 -> 32.
    pack = {4: 8, 2: 16, 1: 32}.get(itemsize, 8)

    # Flatten to a lane-dense (rows, width) slab; pad so every block is full.
    rows = pl.cdiv(total, width)
    bytes_per_row = width * itemsize
    max_rows_per_block = max(pack, target_block_bytes // bytes_per_row)
    num_steps = pl.cdiv(rows, max_rows_per_block)
    row_tile = pl.cdiv(rows, num_steps)
    row_tile = ((row_tile + pack - 1) // pack) * pack
    rows_padded = num_steps * row_tile
    padded_total = rows_padded * width

    flat = x.reshape(-1)
    if padded_total != total:
        flat = jnp.pad(flat, (0, padded_total - total))
    x2d = flat.reshape(rows_padded, width)

    # round() rather than truncation so P(keep) matches 1-p as closely as
    # 31 random bits allow.
    threshold31 = int(round(p * (2 ** 31)))
    scale = 1.0 / (1.0 - p)

    kernel = functools.partial(_dropout_kernel, block_rows=row_tile,
                               width=width, threshold31=threshold31,
                               scale=scale)

    out2d = pl.pallas_call(
        kernel,
        out_shape=jax.ShapeDtypeStruct((rows_padded, width), dtype),
        grid_spec=pltpu.PrefetchScalarGridSpec(
            num_scalar_prefetch=1,
            grid=(num_steps,),
            in_specs=[pl.BlockSpec((row_tile, width), lambda i, seed: (i, 0))],
            out_specs=pl.BlockSpec((row_tile, width), lambda i, seed: (i, 0)),
        ),
        compiler_params=pltpu.CompilerParams(
            # Blocks are independent -> shard across TensorCores on v7x.
            dimension_semantics=("parallel",),
            # 4x block_bytes (in+out, double-buffered) ~= 16 MiB; 32 MiB scoped
            # VMEM is safe on v5e/v6e (128 MiB) and v7x (64 MiB physical).
            vmem_limit_bytes=32 * 1024 * 1024,
        ),
    )(jnp.asarray([seed], jnp.int32), x2d)

    out_flat = out2d.reshape(-1)
    if padded_total != total:
        out_flat = out_flat[:total]
    return out_flat.reshape(orig_shape)


if __name__ == "__main__":
    # Small shape consistent with the module's 4D attention-probs input
    # (original spec shape is (1, 12, 384, 384); use a reduced version).
    key = jax.random.PRNGKey(0)
    x = jax.random.normal(key, (1, 12, 64, 64), dtype=jnp.float32)

    out = jax.block_until_ready(dropout_pallas(x, seed=0))

    # Sanity: shape/dtype preserved, surviving values scaled by 1/(1-p),
    # keep fraction near 1 - p = 0.9.
    assert out.shape == x.shape and out.dtype == x.dtype
    scale = 1.0 / (1.0 - P_DROP)
    nonzero = out != 0
    ratio = jnp.where(nonzero, out / jnp.where(nonzero, x, 1.0), scale)
    assert jnp.allclose(ratio, scale, atol=1e-4, rtol=1e-4)
    keep_frac = float(jnp.mean(nonzero.astype(jnp.float32)))
    assert 0.85 < keep_frac < 0.95, keep_frac

    print("KERNEL_OK")
</pallas_src>

<mosaic_0001>
module attributes {stable_mosaic.version = 11 : i64} {
  func.func @_dropout_kernel(%arg0: i32, %arg1: memref<1xi32, #tpu.memory_space<smem>>, %arg2: memref<96x512xf32, #tpu.memory_space<vmem>>, %arg3: memref<96x512xf32, #tpu.memory_space<vmem>>) attributes {dimension_semantics = [#tpu.dimension_semantics<parallel>], iteration_bounds = array<i64: 1>, scalar_prefetch = 1 : i64, scratch_operands = 0 : i64, tpu.core_type = #tpu.core_type<tc>, window_params = [{transform_indices = @transform_0, window_bounds = array<i64: 96, 512>}, {transform_indices = @transform_1, window_bounds = array<i64: 96, 512>}]} {
    %0 = tpu.iota {dimensions = array<i32: 0>} : vector<96x512xi32>
    %1 = tpu.iota {dimensions = array<i32: 1>} : vector<96x512xi32>
    %c96_i32 = arith.constant 96 : i32
    %2 = arith.muli %arg0, %c96_i32 : i32
    %3 = vector.broadcast %2 : i32 to vector<96x512xi32>
    %4 = arith.addi %3, %0 : vector<96x512xi32>
    %c512_i32 = arith.constant 512 : i32
    %5 = vector.broadcast %c512_i32 : i32 to vector<96x512xi32>
    %6 = arith.muli %4, %5 : vector<96x512xi32>
    %7 = arith.addi %6, %1 : vector<96x512xi32>
    %c0 = arith.constant 0 : index
    %8 = memref.load %arg1[%c0] : memref<1xi32, #tpu.memory_space<smem>>
    %c-1640531527_i32 = arith.constant -1640531527 : i32
    %9 = arith.muli %8, %c-1640531527_i32 : i32
    %10 = vector.broadcast %9 : i32 to vector<96x512xi32>
    %11 = arith.addi %7, %10 : vector<96x512xi32>
    %c16_i32 = arith.constant 16 : i32
    %12 = vector.broadcast %c16_i32 : i32 to vector<96x512xi32>
    %13 = arith.shrui %11, %12 : vector<96x512xi32>
    %14 = arith.xori %11, %13 : vector<96x512xi32>
    %c-2048144789_i32 = arith.constant -2048144789 : i32
    %15 = vector.broadcast %c-2048144789_i32 : i32 to vector<96x512xi32>
    %16 = arith.muli %14, %15 : vector<96x512xi32>
    %c13_i32 = arith.constant 13 : i32
    %17 = vector.broadcast %c13_i32 : i32 to vector<96x512xi32>
    %18 = arith.shrui %16, %17 : vector<96x512xi32>
    %19 = arith.xori %16, %18 : vector<96x512xi32>
    %c-1028477387_i32 = arith.constant -1028477387 : i32
    %20 = vector.broadcast %c-1028477387_i32 : i32 to vector<96x512xi32>
    %21 = arith.muli %19, %20 : vector<96x512xi32>
    %c16_i32_0 = arith.constant 16 : i32
    %22 = vector.broadcast %c16_i32_0 : i32 to vector<96x512xi32>
    %23 = arith.shrui %21, %22 : vector<96x512xi32>
    %24 = arith.xori %21, %23 : vector<96x512xi32>
    %c1_i32 = arith.constant 1 : i32
    %25 = vector.broadcast %c1_i32 : i32 to vector<96x512xi32>
    %26 = arith.shrui %24, %25 : vector<96x512xi32>
    %c214748365_i32 = arith.constant 214748365 : i32
    %27 = vector.broadcast %c214748365_i32 : i32 to vector<96x512xi32>
    %28 = arith.cmpi sge, %26, %27 : vector<96x512xi32>
    %c0_1 = arith.constant 0 : index
    %c0_2 = arith.constant 0 : index
    %29 = vector.load %arg2[%c0_1, %c0_2] : memref<96x512xf32, #tpu.memory_space<vmem>>, vector<96x512xf32>
    %30 = arith.extui %28 : vector<96x512xi1> to vector<96x512xi32>
    %31 = arith.sitofp %30 : vector<96x512xi32> to vector<96x512xf32>
    %cst = arith.constant 1.11111116 : f32
    %32 = vector.broadcast %cst : f32 to vector<96x512xf32>
    %33 = arith.mulf %31, %32 : vector<96x512xf32>
    %34 = arith.mulf %29, %33 : vector<96x512xf32>
    %c0_3 = arith.constant 0 : index
    %c0_4 = arith.constant 0 : index
    %35 = vector.load %arg3[%c0_3, %c0_4] : memref<96x512xf32, #tpu.memory_space<vmem>>, vector<96x512xf32>
    tpu.vector_store %arg3[%c0_3, %c0_4], %34 {strides = array<i32>} : memref<96x512xf32, #tpu.memory_space<vmem>>, vector<96x512xf32>,
    return
  }
  func.func @transform_0(%arg0: i32, %arg1: memref<1xi32, #tpu.memory_space<smem>>) -> (i32, i32) {
    %c0_i32 = arith.constant 0 : i32
    %c0_i32_0 = arith.constant 0 : i32
    return %arg0, %c0_i32 : i32, i32
  }
  func.func @transform_1(%arg0: i32, %arg1: memref<1xi32, #tpu.memory_space<smem>>) -> (i32, i32) {
    %c0_i32 = arith.constant 0 : i32
    %c0_i32_0 = arith.constant 0 : i32
    return %arg0, %c0_i32 : i32, i32
  }
}

</mosaic_0001>

<bundles_post_ra>
// kernel: tpu_custom_call.1
= control target key start
LH: loop header
LB: loop body
LE: loop exit
PB: predicated region body
PF: predicated region fallthrough
CT: control target
= control target key end

     0   :  { %8 = vsyncpa [#allocation5], 0  ;;  %s1323_s0 = inlined_call_operand.<no memory space> [shape: s32[1], index: 0, kind: input, shape index: {}]   ;;  %s1324_s1 = inlined_call_operand.hbm [shape: f32[96,512], index: 1, kind: input, shape index: {}]   ;;  %s1325_s2 = inlined_call_operand.hbm [shape: f32[96,512], index: 2, kind: output, shape index: {}]  }
   0x1   :  { %9 = vsyncpa [#allocation6], 0  ;;  %s1054_s9 = smov [#allocation4]   ;;  %s1006_s13 = scalar_lea.hbm %s1324_s1, 6144 }
   0x2   :  { %s15_s10 = sshll.u32 %s1054_s9, 4  ;;  %p1007_p0 = scmp.ne.s32.totalorder %s1324_s1, %s1006_s13  ;;  %s16_s10 = int_to_ptr.vmem [resolvable:$true] %s15_s10 }
   0x3   :  { %p1010_p1 = scmp.lt.u32.totalorder %s1006_s13, %s1324_s1 }
   0x5   :  { %p1012_p2 = pnand %p1010_p1, %p1007_p0 }
   0x7   :  { %1015 = shalt.err (!%p1012_p2)
}
   0x8   :  { %s1016_s18 = scalar_lea.vmem %s16_s10, 6144  ;;  %p1021_p4 = scmp.lt.s32.totalorder %s16_s10, %s16_s10 }
   0x9   :  { %p1017_p3 = scmp.ne.s32.totalorder %s16_s10, %s1016_s18  ;;  %p1022_p5 = scmp.lt.s32.totalorder %s1016_s18, %s1016_s18 }
   0xb   :  { %p1023_p6 = por %p1022_p5, %p1021_p4 }
   0xd   :  { %p1024_p7 = pnand %p1023_p6, %p1017_p3 }
   0xf   :  { %1027 = shalt.err (!%p1024_p7)
}
  0x10   :  { %s1055_s19 = smov 512   ;;  %s1056_s20 = smov 32  }
  0x11   :  { %21 = dma.hbm_to_vmem [thread:$0]  %s1324_s1, 6144, %s16_s10, [#allocation5], %s1055_s19, %s1055_s19, %s1056_s20  }
  0x12   :  { %1050 = dma.done.wait [#allocation5], 6144  }
  0x13   :  { %1051 = vsyncadd [#allocation5], 4294961152  ;;  %v25_v0 = vlaneseq  ;;  %s118_s25 = smul.u32 2654435769, %s1323_s0  ;;  %s1058_s0 = smov [#allocation7]  }
  0x14   :  { %s941_s1 = sshll.u32 %s1058_s0, 4  ;;  %s942_s1 = int_to_ptr.vmem [resolvable:$true] %s941_s1 }
  0x15   :  { %v1092_v1 = vshrl.u32 %v25_v0, 7  ;;  %v1094_v2 = vand.u32 127, %v25_v0  ;;  %v1106_v7 = vstv %s118_s25  ;;  %s1028_s26 = scalar_lea.vmem %s942_s1, 6144  ;;  %p1033_p9 = scmp.lt.s32.totalorder %s942_s1, %s942_s1 }
  0x16   :  { %p1029_p8 = scmp.ne.s32.totalorder %s942_s1, %s1028_s26  ;;  %p1034_p10 = scmp.lt.s32.totalorder %s1028_s26, %s1028_s26 }
  0x17   :  { %v57_v3 = vmul.u32 512, %v1092_v1  ;;  %v1098_v4 = vadd.s32 128, %v1094_v2  ;;  %v1101_v5 = vadd.s32 256, %v1094_v2  ;;  %v1104_v6 = vadd.s32 384, %v1094_v2 }
  0x18   :  { %v27_v8 = vadd.s32 8, %v1092_v1  ;;  %v28_v9 = vadd.s32 16, %v1092_v1  ;;  %v1111_v10 = vadd.s32 24, %v1092_v1  ;;  %v1120_v17 = vadd.s32 32, %v1092_v1  ;;  %p1035_p11 = por %p1034_p10, %p1033_p9 }
  0x19   :  { %v69_v11 = vadd.s32 %v57_v3, %v1094_v2  ;;  %v70_v12 = vadd.s32 %v57_v3, %v1098_v4  ;;  %v71_v13 = vadd.s32 %v57_v3, %v1101_v5  ;;  %v72_v14 = vadd.s32 %v57_v3, %v1104_v6 }
  0x1a   :  { %v58_v15 = vmul.u32 512, %v27_v8  ;;  %v1117_v16 = vmul.u32 512, %v28_v9  ;;  %v1123_v18 = vadd.s32 40, %v1092_v1  ;;  %p1036_p12 = pnand %p1035_p11, %p1029_p8 }
  0x1b   :  { %v120_v19 = vadd.s32 %v1106_v7, %v69_v11  ;;  %v121_v20 = vadd.s32 %v1106_v7, %v70_v12  ;;  %v122_v21 = vadd.s32 %v1106_v7, %v71_v13  ;;  %v123_v22 = vadd.s32 %v1106_v7, %v72_v14 }
  0x1c   :  { %v73_v23 = vadd.s32 %v58_v15, %v1094_v2  ;;  %v74_v24 = vadd.s32 %v58_v15, %v1098_v4  ;;  %v75_v25 = vadd.s32 %v58_v15, %v1101_v5  ;;  %v76_v26 = vadd.s32 %v58_v15, %v1104_v6 }
  0x1d   :  { %v168_v27 = vshrl.u32 %v120_v19, 16  ;;  %v169_v28 = vshrl.u32 %v121_v20, 16  ;;  %v170_v29 = vshrl.u32 %v122_v21, 16  ;;  %v171_v30 = vshrl.u32 %v123_v22, 16 }
  0x1e   :  { %v124_v31 = vadd.s32 %v1106_v7, %v73_v23  ;;  %v125_v32 = vadd.s32 %v1106_v7, %v74_v24  ;;  %v126_v33 = vadd.s32 %v1106_v7, %v75_v25  ;;  %v127_v34 = vadd.s32 %v1106_v7, %v76_v26 }
  0x1f   :  { %v216_v35 = vxor.u32 %v168_v27, %v120_v19  ;;  %v217_v36 = vxor.u32 %v169_v28, %v121_v20  ;;  %v218_v37 = vxor.u32 %v170_v29, %v122_v21  ;;  %v219_v38 = vxor.u32 %v171_v30, %v123_v22 }
  0x20   :  { %v172_v39 = vshrl.u32 %v124_v31, 16  ;;  %v173_v40 = vshrl.u32 %v125_v32, 16  ;;  %v174_v41 = vshrl.u32 %v126_v33, 16  ;;  %v175_v42 = vshrl.u32 %v127_v34, 16 }
  0x21   :  { %v264_v43 = vmul.u32 2246822507, %v216_v35  ;;  %v265_v44 = vmul.u32 2246822507, %v217_v36  ;;  %v1139_v45 = vadd.s32 %v1117_v16, %v1094_v2  ;;  %v1143_v46 = vadd.s32 %v1117_v16, %v1098_v4 }
  0x22   :  { %v266_v47 = vmul.u32 2246822507, %v218_v37  ;;  %v267_v48 = vmul.u32 2246822507, %v219_v38  ;;  %v220_v49 = vxor.u32 %v172_v39, %v124_v31  ;;  %v221_v50 = vxor.u32 %v173_v40, %v125_v32 }
  0x23   :  { %v312_v51 = vshrl.u32 %v264_v43, 13  ;;  %v313_v52 = vshrl.u32 %v265_v44, 13  ;;  %v222_v53 = vxor.u32 %v174_v41, %v126_v33  ;;  %v223_v54 = vxor.u32 %v175_v42, %v127_v34  ;;  %v648_v41 = vld [vmem:[#allocation4] sm:$0xff]  ;;  %v649_v42 = vld [vmem:[#allocation4 + $0x8] sm:$0xff] }
  0x24   :  { %v314_v55 = vshrl.u32 %v266_v47, 13  ;;  %v315_v56 = vshrl.u32 %v267_v48, 13  ;;  %v268_v57 = vmul.u32 2246822507, %v220_v49  ;;  %v269_v58 = vmul.u32 2246822507, %v221_v50 }
  0x25   :  { %v360_v59 = vxor.u32 %v312_v51, %v264_v43  ;;  %v361_v60 = vxor.u32 %v313_v52, %v265_v44  ;;  %v270_v61 = vmul.u32 2246822507, %v222_v53  ;;  %v271_v62 = vmul.u32 2246822507, %v223_v54  ;;  %v650_v49 = vld [vmem:[#allocation4 + $0x10] sm:$0xff]  ;;  %v651_v50 = vld [vmem:[#allocation4 + $0x18] sm:$0xff] }
  0x26   :  { %v362_v63 = vxor.u32 %v314_v55, %v266_v47  ;;  %v363_v0 = vxor.u32 %v315_v56, %v267_v48  ;;  %v316_v3 = vshrl.u32 %v268_v57, 13  ;;  %v317_v8 = vshrl.u32 %v269_v58, 13 }
  0x27   :  { %v408_v9 = vmul.u32 3266489909, %v360_v59  ;;  %v409_v11 = vmul.u32 3266489909, %v361_v60  ;;  %v318_v12 = vshrl.u32 %v270_v61, 13  ;;  %v319_v13 = vshrl.u32 %v271_v62, 13 }
  0x28   :  { %v410_v14 = vmul.u32 3266489909, %v362_v63  ;;  %v411_v15 = vmul.u32 3266489909, %v363_v0  ;;  %v364_v19 = vxor.u32 %v316_v3, %v268_v57  ;;  %v365_v20 = vxor.u32 %v317_v8, %v269_v58  ;;  %v652_v8 = vld [vmem:[#allocation4 + $0x20] sm:$0xff] }
  0x29   :  { %v456_v21 = vshrl.u32 %v408_v9, 16  ;;  %v457_v22 = vshrl.u32 %v409_v11, 16  ;;  %v366_v23 = vxor.u32 %v318_v12, %v270_v61  ;;  %v367_v24 = vxor.u32 %v319_v13, %v271_v62 }
  0x2a   :  { %v458_v25 = vshrl.u32 %v410_v14, 16  ;;  %v459_v26 = vshrl.u32 %v411_v15, 16  ;;  %v412_v27 = vmul.u32 3266489909, %v364_v19  ;;  %v413_v28 = vmul.u32 3266489909, %v365_v20 }
  0x2b   :  { %v504_v29 = vxor.u32 %v456_v21, %v408_v9  ;;  %v505_v30 = vxor.u32 %v457_v22, %v409_v11  ;;  %v414_v31 = vmul.u32 3266489909, %v366_v23  ;;  %v415_v32 = vmul.u32 3266489909, %v367_v24  ;;  %v653_v9 = vld [vmem:[#allocation4 + $0x28] sm:$0xff]  ;;  %v655_v19 = vld [vmem:[#allocation4 + $0x38] sm:$0xff] }
  0x2c   :  { %v506_v33 = vxor.u32 %v458_v25, %v410_v14  ;;  %v507_v34 = vxor.u32 %v459_v26, %v411_v15  ;;  %v460_v35 = vshrl.u32 %v412_v27, 16  ;;  %v461_v36 = vshrl.u32 %v413_v28, 16  ;;  %v654_v15 = vld [vmem:[#allocation4 + $0x30] sm:$0xff] }
  0x2d   :  { %v552_v37 = vshrl.u32 %v504_v29, 1  ;;  %v553_v38 = vshrl.u32 %v505_v30, 1  ;;  %v462_v39 = vshrl.u32 %v414_v31, 16  ;;  %v463_v40 = vshrl.u32 %v415_v32, 16 }
  0x2e   :  { %v554_v43 = vshrl.u32 %v506_v33, 1  ;;  %v555_v44 = vshrl.u32 %v507_v34, 1  ;;  %v508_v47 = vxor.u32 %v460_v35, %v412_v27  ;;  %v509_v48 = vxor.u32 %v461_v36, %v413_v28 }
  0x2f   :  { %vm600_vm0 = vcmp.ge.s32.totalorder %v552_v37, 214748365  ;;  %vm601_vm1 = vcmp.ge.s32.totalorder %v553_v38, 214748365  ;;  %v510_v51 = vxor.u32 %v462_v39, %v414_v31  ;;  %v511_v52 = vxor.u32 %v463_v40, %v415_v32 }
  0x30   :  { %v1057_v53 = vmov 0.0   ;;  %vm602_vm2 = vcmp.ge.s32.totalorder %v554_v43, 214748365  ;;  %vm603_vm3 = vcmp.ge.s32.totalorder %v555_v44, 214748365  ;;  %v556_v62 = vshrl.u32 %v508_v47, 1 }
  0x31   :  { %v953_v54 = vsel %vm600_vm0, 1.0, %v1057_v53  ;;  %v954_v55 = vsel %vm601_vm1, 1.0, %v1057_v53  ;;  %v955_v58 = vsel %vm602_vm2, 1.0, %v1057_v53  ;;  %v956_v59 = vsel %vm603_vm3, 1.0, %v1057_v53 }
  0x32   :  { %v792_v56 = vmul.f32 1.1111112, %v953_v54  ;;  %v793_v57 = vmul.f32 1.1111112, %v954_v55  ;;  %v794_v60 = vmul.f32 1.1111112, %v955_v58  ;;  %v128_v28 = vadd.s32 %v1106_v7, %v1139_v45 }
  0x33   :  { %v795_v61 = vmul.f32 1.1111112, %v956_v59  ;;  %v557_v63 = vshrl.u32 %v509_v48, 1  ;;  %v558_v11 = vshrl.u32 %v510_v51, 1  ;;  %v559_v12 = vshrl.u32 %v511_v52, 1 }
  0x34   :  { %v840_v0 = vmul.f32 %v792_v56, %v648_v41  ;;  %v841_v3 = vmul.f32 %v793_v57, %v649_v42  ;;  %v842_v13 = vmul.f32 %v794_v60, %v650_v49  ;;  %vm604_vm4 = vcmp.ge.s32.totalorder %v556_v62, 214748365 }
  0x35   :  { %v843_v14 = vmul.f32 %v795_v61, %v651_v50  ;;  %vm605_vm5 = vcmp.ge.s32.totalorder %v557_v63, 214748365  ;;  %v957_v20 = vsel %vm604_vm4, 1.0, %v1057_v53  ;;  %vm606_vm6 = vcmp.ge.s32.totalorder %v558_v11, 214748365 }
  0x36   :  { %888 = vst [vmem:[#allocation7] sm:$0xff] %v840_v0  ;;  %889 = vst [vmem:[#allocation7 + $0x8] sm:$0xff] %v841_v3  ;;  %v958_v21 = vsel %vm605_vm5, 1.0, %v1057_v53  ;;  %vm607_vm7 = vcmp.ge.s32.totalorder %v559_v12, 214748365  ;;  %v959_v24 = vsel %vm606_vm6, 1.0, %v1057_v53  ;;  %v129_v29 = vadd.s32 %v1106_v7, %v1143_v46 }
  0x37   :  { %890 = vst [vmem:[#allocation7 + $0x10] sm:$0xff] %v842_v13  ;;  %891 = vst [vmem:[#allocation7 + $0x18] sm:$0xff] %v843_v14  ;;  %v796_v22 = vmul.f32 1.1111112, %v957_v20  ;;  %v797_v23 = vmul.f32 1.1111112, %v958_v21  ;;  %v79_v32 = vadd.s32 %v1117_v16, %v1101_v5  ;;  %v80_v33 = vadd.s32 %v1117_v16, %v1104_v6 }
  0x38   :  { %v960_v25 = vsel %vm607_vm7, 1.0, %v1057_v53  ;;  %v798_v26 = vmul.f32 1.1111112, %v959_v24  ;;  %v176_v36 = vshrl.u32 %v128_v28, 16  ;;  %v177_v37 = vshrl.u32 %v129_v29, 16 }
  0x39   :  { %v799_v27 = vmul.f32 1.1111112, %v960_v25  ;;  %v844_v30 = vmul.f32 %v796_v22, %v652_v8  ;;  %v845_v31 = vmul.f32 %v797_v23, %v653_v9  ;;  %v130_v38 = vadd.s32 %v1106_v7, %v79_v32 }
  0x3a   :  { %v846_v34 = vmul.f32 %v798_v26, %v654_v15  ;;  %v131_v45 = vadd.s32 %v1106_v7, %v80_v33  ;;  %v60_v46 = vmul.u32 512, %v1111_v10  ;;  %v1165_v39 = vmul.u32 512, %v1120_v17 }
  0x3b   :  { %v847_v35 = vmul.f32 %v799_v27, %v655_v19  ;;  %892 = vst [vmem:[#allocation7 + $0x20] sm:$0xff] %v844_v30  ;;  %893 = vst [vmem:[#allocation7 + $0x28] sm:$0xff] %v845_v31  ;;  %v224_v40 = vxor.u32 %v176_v36, %v128_v28  ;;  %v225_v41 = vxor.u32 %v177_v37, %v129_v29  ;;  %v1168_v16 = vmul.u32 512, %v1123_v18 }
  0x3c   :  { %894 = vst [vmem:[#allocation7 + $0x30] sm:$0xff] %v846_v34  ;;  %v1171_v42 = vadd.s32 48, %v1092_v1  ;;  %v178_v43 = vshrl.u32 %v130_v38, 16  ;;  %v179_v44 = vshrl.u32 %v131_v45, 16  ;;  %v81_v47 = vadd.s32 %v60_v46, %v1094_v2 }
  0x3d   :  { %895 = vst [vmem:[#allocation7 + $0x38] sm:$0xff] %v847_v35  ;;  %v82_v48 = vadd.s32 %v60_v46, %v1098_v4  ;;  %v272_v10 = vmul.u32 2246822507, %v224_v40  ;;  %v273_v49 = vmul.u32 2246822507, %v225_v41  ;;  %v83_v17 = vadd.s32 %v60_v46, %v1101_v5 }
  0x3e   :  { %v84_v50 = vadd.s32 %v60_v46, %v1104_v6  ;;  %v226_v51 = vxor.u32 %v178_v43, %v130_v38  ;;  %v227_v52 = vxor.u32 %v179_v44, %v131_v45  ;;  %v132_v18 = vadd.s32 %v1106_v7, %v81_v47 }
  0x3f   :  { %v133_v54 = vadd.s32 %v1106_v7, %v82_v48  ;;  %v320_v55 = vshrl.u32 %v272_v10, 13  ;;  %v321_v56 = vshrl.u32 %v273_v49, 13  ;;  %v134_v57 = vadd.s32 %v1106_v7, %v83_v17 }
  0x40   :  { %v135_v58 = vadd.s32 %v1106_v7, %v84_v50  ;;  %v274_v59 = vmul.u32 2246822507, %v226_v51  ;;  %v275_v60 = vmul.u32 2246822507, %v227_v52  ;;  %v180_v61 = vshrl.u32 %v132_v18, 16  ;;  %v656_v51 = vld [vmem:[#allocation4 + $0x40] sm:$0xff] }
  0x41   :  { %v181_v62 = vshrl.u32 %v133_v54, 16  ;;  %v368_v63 = vxor.u32 %v320_v55, %v272_v10  ;;  %v369_v0 = vxor.u32 %v321_v56, %v273_v49  ;;  %v182_v3 = vshrl.u32 %v134_v57, 16 }
  0x42   :  { %v183_v8 = vshrl.u32 %v135_v58, 16  ;;  %v322_v9 = vshrl.u32 %v274_v59, 13  ;;  %v323_v11 = vshrl.u32 %v275_v60, 13  ;;  %v228_v12 = vxor.u32 %v180_v61, %v132_v18  ;;  %v657_v18 = vld [vmem:[#allocation4 + $0x48] sm:$0xff] }
  0x43   :  { %v229_v13 = vxor.u32 %v181_v62, %v133_v54  ;;  %v416_v14 = vmul.u32 3266489909, %v368_v63  ;;  %v417_v15 = vmul.u32 3266489909, %v369_v0  ;;  %v230_v19 = vxor.u32 %v182_v3, %v134_v57  ;;  %v658_v3 = vld [vmem:[#allocation4 + $0x50] sm:$0xff] }
  0x44   :  { %v231_v20 = vxor.u32 %v183_v8, %v135_v58  ;;  %v370_v21 = vxor.u32 %v322_v9, %v274_v59  ;;  %v371_v22 = vxor.u32 %v323_v11, %v275_v60  ;;  %v276_v23 = vmul.u32 2246822507, %v228_v12  ;;  %v659_v9 = vld [vmem:[#allocation4 + $0x58] sm:$0xff] }
  0x45   :  { %v277_v24 = vmul.u32 2246822507, %v229_v13  ;;  %v464_v25 = vshrl.u32 %v416_v14, 16  ;;  %v465_v26 = vshrl.u32 %v417_v15, 16  ;;  %v278_v27 = vmul.u32 2246822507, %v230_v19 }
  0x46   :  { %v279_v28 = vmul.u32 2246822507, %v231_v20  ;;  %v418_v29 = vmul.u32 3266489909, %v370_v21  ;;  %v324_v31 = vshrl.u32 %v276_v23, 13  ;;  %v85_v50 = vadd.s32 %v1165_v39, %v1094_v2 }
  0x47   :  { %v419_v30 = vmul.u32 3266489909, %v371_v22  ;;  %v325_v32 = vshrl.u32 %v277_v24, 13  ;;  %v512_v33 = vxor.u32 %v464_v25, %v416_v14  ;;  %v513_v34 = vxor.u32 %v465_v26, %v417_v15 }
  0x48   :  { %v326_v35 = vshrl.u32 %v278_v27, 13  ;;  %v327_v36 = vshrl.u32 %v279_v28, 13  ;;  %v466_v37 = vshrl.u32 %v418_v29, 16  ;;  %v372_v45 = vxor.u32 %v324_v31, %v276_v23  ;;  %v660_v31 = vld [vmem:[#allocation4 + $0x60] sm:$0xff] }
  0x49   :  { %v467_v38 = vshrl.u32 %v419_v30, 16  ;;  %v373_v46 = vxor.u32 %v325_v32, %v277_v24  ;;  %v560_v40 = vshrl.u32 %v512_v33, 1  ;;  %v561_v41 = vshrl.u32 %v513_v34, 1 }
  0x4a   :  { %v374_v43 = vxor.u32 %v326_v35, %v278_v27  ;;  %v375_v44 = vxor.u32 %v327_v36, %v279_v28  ;;  %v514_v47 = vxor.u32 %v466_v37, %v418_v29  ;;  %v420_v10 = vmul.u32 3266489909, %v372_v45  ;;  %v661_v35 = vld [vmem:[#allocation4 + $0x68] sm:$0xff]  ;;  %v662_v37 = vld [vmem:[#allocation4 + $0x70] sm:$0xff] }
  0x4b   :  { %v515_v48 = vxor.u32 %v467_v38, %v419_v30  ;;  %v421_v49 = vmul.u32 3266489909, %v373_v46  ;;  %vm608_vm8 = vcmp.ge.s32.totalorder %v560_v40, 214748365  ;;  %vm609_vm9 = vcmp.ge.s32.totalorder %v561_v41, 214748365 }
  0x4c   :  { %v422_v17 = vmul.u32 3266489909, %v374_v43  ;;  %v961_v52 = vsel %vm608_vm8, 1.0, %v1057_v53  ;;  %v962_v54 = vsel %vm609_vm9, 1.0, %v1057_v53  ;;  %v562_v55 = vshrl.u32 %v514_v47, 1 }
  0x4d   :  { %v563_v56 = vshrl.u32 %v515_v48, 1  ;;  %v800_v57 = vmul.f32 1.1111112, %v961_v52  ;;  %v801_v58 = vmul.f32 1.1111112, %v962_v54  ;;  %v468_v59 = vshrl.u32 %v420_v10, 16 }
  0x4e   :  { %v469_v60 = vshrl.u32 %v421_v49, 16  ;;  %vm610_vm10 = vcmp.ge.s32.totalorder %v562_v55, 214748365  ;;  %v470_v61 = vshrl.u32 %v422_v17, 16  ;;  %v136_v62 = vadd.s32 %v1106_v7, %v85_v50 }
  0x4f   :  { %vm611_vm11 = vcmp.ge.s32.totalorder %v563_v56, 214748365  ;;  %v848_v63 = vmul.f32 %v800_v57, %v656_v51  ;;  %v849_v0 = vmul.f32 %v801_v58, %v657_v18  ;;  %v963_v8 = vsel %vm610_vm10, 1.0, %v1057_v53  ;;  %v663_v18 = vld [vmem:[#allocation4 + $0x78] sm:$0xff] }
  0x50   :  { %v964_v11 = vsel %vm611_vm11, 1.0, %v1057_v53  ;;  %v802_v12 = vmul.f32 1.1111112, %v963_v8  ;;  %v516_v14 = vxor.u32 %v468_v59, %v420_v10  ;;  %v517_v15 = vxor.u32 %v469_v60, %v421_v49 }
  0x51   :  { %v803_v13 = vmul.f32 1.1111112, %v964_v11  ;;  %896 = vst [vmem:[#allocation7 + $0x40] sm:$0xff] %v848_v63  ;;  %897 = vst [vmem:[#allocation7 + $0x48] sm:$0xff] %v849_v0  ;;  %v518_v19 = vxor.u32 %v470_v61, %v422_v17  ;;  %v423_v20 = vmul.u32 3266489909, %v375_v44  ;;  %v86_v22 = vadd.s32 %v1165_v39, %v1098_v4 }
  0x52   :  { %v184_v21 = vshrl.u32 %v136_v62, 16  ;;  %v850_v23 = vmul.f32 %v802_v12, %v658_v3  ;;  %v564_v25 = vshrl.u32 %v516_v14, 1  ;;  %v565_v26 = vshrl.u32 %v517_v15, 1 }
  0x53   :  { %v851_v24 = vmul.f32 %v803_v13, %v659_v9  ;;  %v566_v27 = vshrl.u32 %v518_v19, 1  ;;  %v471_v28 = vshrl.u32 %v423_v20, 16  ;;  %v137_v30 = vadd.s32 %v1106_v7, %v86_v22 }
  0x54   :  { %v232_v29 = vxor.u32 %v184_v21, %v136_v62  ;;  %898 = vst [vmem:[#allocation7 + $0x50] sm:$0xff] %v850_v23  ;;  %vm612_vm12 = vcmp.ge.s32.totalorder %v564_v25, 214748365  ;;  %vm613_vm13 = vcmp.ge.s32.totalorder %v565_v26, 214748365  ;;  %v87_v32 = vadd.s32 %v1165_v39, %v1101_v5 }
  0x55   :  { %899 = vst [vmem:[#allocation7 + $0x58] sm:$0xff] %v851_v24  ;;  %v88_v33 = vadd.s32 %v1165_v39, %v1104_v6  ;;  %v965_v34 = vsel %vm612_vm12, 1.0, %v1057_v53  ;;  %v966_v36 = vsel %vm613_vm13, 1.0, %v1057_v53  ;;  %vm614_vm14 = vcmp.ge.s32.totalorder %v566_v27, 214748365 }
  0x56   :  { %v519_v38 = vxor.u32 %v471_v28, %v423_v20  ;;  %v804_v45 = vmul.f32 1.1111112, %v965_v34  ;;  %v805_v46 = vmul.f32 1.1111112, %v966_v36  ;;  %v967_v40 = vsel %vm614_vm14, 1.0, %v1057_v53 }
  0x57   :  { %v185_v41 = vshrl.u32 %v137_v30, 16  ;;  %v806_v43 = vmul.f32 1.1111112, %v967_v40  ;;  %v280_v47 = vmul.u32 2246822507, %v232_v29  ;;  %v138_v48 = vadd.s32 %v1106_v7, %v87_v32 }
  0x58   :  { %v567_v44 = vshrl.u32 %v519_v38, 1  ;;  %v852_v10 = vmul.f32 %v804_v45, %v660_v31  ;;  %v853_v39 = vmul.f32 %v805_v46, %v661_v35  ;;  %v139_v17 = vadd.s32 %v1106_v7, %v88_v33 }
  0x59   :  { %v233_v49 = vxor.u32 %v185_v41, %v137_v30  ;;  %v854_v50 = vmul.f32 %v806_v43, %v662_v37  ;;  %v328_v51 = vshrl.u32 %v280_v47, 13  ;;  %v186_v52 = vshrl.u32 %v138_v48, 16 }
  0x5a   :  { %vm615_vm15 = vcmp.ge.s32.totalorder %v567_v44, 214748365  ;;  %900 = vst [vmem:[#allocation7 + $0x60] sm:$0xff] %v852_v10  ;;  %901 = vst [vmem:[#allocation7 + $0x68] sm:$0xff] %v853_v39  ;;  %v187_v56 = vshrl.u32 %v139_v17, 16  ;;  %v89_v57 = vadd.s32 %v1168_v16, %v1094_v2  ;;  %v90_v61 = vadd.s32 %v1168_v16, %v1098_v4 }
  0x5b   :  { %v968_v54 = vsel %vm615_vm15, 1.0, %v1057_v53  ;;  %v281_v55 = vmul.u32 2246822507, %v233_v49  ;;  %902 = vst [vmem:[#allocation7 + $0x70] sm:$0xff] %v854_v50  ;;  %v376_v59 = vxor.u32 %v328_v51, %v280_v47  ;;  %v234_v60 = vxor.u32 %v186_v52, %v138_v48  ;;  %v664_v48 = vld [vmem:[#allocation4 + $0x80] sm:$0xff] }
  0x5c   :  { %v807_v58 = vmul.f32 1.1111112, %v968_v54  ;;  %v235_v63 = vxor.u32 %v187_v56, %v139_v17  ;;  %v140_v0 = vadd.s32 %v1106_v7, %v89_v57  ;;  %v91_v3 = vadd.s32 %v1168_v16, %v1101_v5 }
  0x5d   :  { %v329_v62 = vshrl.u32 %v281_v55, 13  ;;  %v424_v9 = vmul.u32 3266489909, %v376_v59  ;;  %v282_v11 = vmul.u32 2246822507, %v234_v60  ;;  %v141_v12 = vadd.s32 %v1106_v7, %v90_v61 }
  0x5e   :  { %v855_v8 = vmul.f32 %v807_v58, %v663_v18  ;;  %v283_v14 = vmul.u32 2246822507, %v235_v63  ;;  %v188_v15 = vshrl.u32 %v140_v0, 16  ;;  %v142_v19 = vadd.s32 %v1106_v7, %v91_v3  ;;  %v665_v58 = vld [vmem:[#allocation4 + $0x88] sm:$0xff] }
  0x5f   :  { %v377_v13 = vxor.u32 %v329_v62, %v281_v55  ;;  %v472_v20 = vshrl.u32 %v424_v9, 16  ;;  %v330_v21 = vshrl.u32 %v282_v11, 13  ;;  %v189_v22 = vshrl.u32 %v141_v12, 16 }
  0x60   :  { %903 = vst [vmem:[#allocation7 + $0x78] sm:$0xff] %v855_v8  ;;  %v92_v23 = vadd.s32 %v1168_v16, %v1104_v6  ;;  %v331_v25 = vshrl.u32 %v283_v14, 13  ;;  %v236_v26 = vxor.u32 %v188_v15, %v140_v0  ;;  %v190_v27 = vshrl.u32 %v142_v19, 16 }
  0x61   :  { %v425_v24 = vmul.u32 3266489909, %v377_v13  ;;  %v520_v28 = vxor.u32 %v472_v20, %v424_v9  ;;  %v378_v29 = vxor.u32 %v330_v21, %v282_v11  ;;  %v237_v30 = vxor.u32 %v189_v22, %v141_v12  ;;  %v666_v13 = vld [vmem:[#allocation4 + $0x90] sm:$0xff]  ;;  %v667_v20 = vld [vmem:[#allocation4 + $0x98] sm:$0xff] }
  0x62   :  { %v143_v31 = vadd.s32 %v1106_v7, %v92_v23  ;;  %v379_v33 = vxor.u32 %v331_v25, %v283_v14  ;;  %v284_v34 = vmul.u32 2246822507, %v236_v26  ;;  %v238_v35 = vxor.u32 %v190_v27, %v142_v19 }
  0x63   :  { %v473_v32 = vshrl.u32 %v425_v24, 16  ;;  %v568_v36 = vshrl.u32 %v520_v28, 1  ;;  %v426_v37 = vmul.u32 3266489909, %v378_v29  ;;  %v285_v38 = vmul.u32 2246822507, %v237_v30 }
  0x64   :  { %v191_v45 = vshrl.u32 %v143_v31, 16  ;;  %v427_v40 = vmul.u32 3266489909, %v379_v33  ;;  %v332_v16 = vshrl.u32 %v284_v34, 13  ;;  %v286_v41 = vmul.u32 2246822507, %v238_v35 }
  0x65   :  { %v521_v46 = vxor.u32 %v473_v32, %v425_v24  ;;  %vm616_vm0 = vcmp.ge.s32.totalorder %v568_v36, 214748365  ;;  %v474_v43 = vshrl.u32 %v426_v37, 16  ;;  %v333_v44 = vshrl.u32 %v285_v38, 13 }
  0x66   :  { %v239_v47 = vxor.u32 %v191_v45, %v143_v31  ;;  %v969_v10 = vsel %vm616_vm0, 1.0, %v1057_v53  ;;  %v475_v49 = vshrl.u32 %v427_v40, 16  ;;  %v380_v17 = vxor.u32 %v332_v16, %v284_v34  ;;  %v668_v34 = vld [vmem:[#allocation4 + $0xa0] sm:$0xff]  ;;  %v669_v45 = vld [vmem:[#allocation4 + $0xa8] sm:$0xff] }
  0x67   :  { %v569_v39 = vshrl.u32 %v521_v46, 1  ;;  %v808_v50 = vmul.f32 1.1111112, %v969_v10  ;;  %v522_v51 = vxor.u32 %v474_v43, %v426_v37  ;;  %v381_v52 = vxor.u32 %v333_v44, %v285_v38 }
  0x68   :  { %v334_v18 = vshrl.u32 %v286_v41, 13  ;;  %v523_v54 = vxor.u32 %v475_v49, %v427_v40  ;;  %v428_v55 = vmul.u32 3266489909, %v380_v17  ;;  %v287_v56 = vmul.u32 2246822507, %v239_v47 }
  0x69   :  { %vm617_vm1 = vcmp.ge.s32.totalorder %v569_v39, 214748365  ;;  %v856_v57 = vmul.f32 %v808_v50, %v664_v48  ;;  %v570_v60 = vshrl.u32 %v522_v51, 1  ;;  %v429_v61 = vmul.u32 3266489909, %v381_v52  ;;  %v670_v52 = vld [vmem:[#allocation4 + $0xb0] sm:$0xff] }
  0x6a   :  { %v970_v59 = vsel %vm617_vm1, 1.0, %v1057_v53  ;;  %v571_v63 = vshrl.u32 %v523_v54, 1  ;;  %v476_v0 = vshrl.u32 %v428_v55, 16  ;;  %v382_v3 = vxor.u32 %v334_v18, %v286_v41 }
  0x6b   :  { %v809_v62 = vmul.f32 1.1111112, %v970_v59  ;;  %904 = vst [vmem:[#allocation7 + $0x80] sm:$0xff] %v856_v57  ;;  %vm618_vm2 = vcmp.ge.s32.totalorder %v570_v60, 214748365  ;;  %v477_v8 = vshrl.u32 %v429_v61, 16 }
  0x6c   :  { %v335_v9 = vshrl.u32 %v287_v56, 13  ;;  %v63_v11 = vmul.u32 512, %v1171_v42  ;;  %v971_v14 = vsel %vm618_vm2, 1.0, %v1057_v53  ;;  %vm619_vm3 = vcmp.ge.s32.totalorder %v571_v63, 214748365 }
  0x6d   :  { %v857_v12 = vmul.f32 %v809_v62, %v665_v58  ;;  %v524_v15 = vxor.u32 %v476_v0, %v428_v55  ;;  %v810_v19 = vmul.f32 1.1111112, %v971_v14  ;;  %v972_v21 = vsel %vm619_vm3, 1.0, %v1057_v53 }
  0x6e   :  { %v525_v22 = vxor.u32 %v477_v8, %v429_v61  ;;  %v430_v23 = vmul.u32 3266489909, %v382_v3  ;;  %v811_v24 = vmul.f32 1.1111112, %v972_v21  ;;  %v383_v26 = vxor.u32 %v335_v9, %v287_v56  ;;  %v671_v3 = vld [vmem:[#allocation4 + $0xb8] sm:$0xff] }
  0x6f   :  { %905 = vst [vmem:[#allocation7 + $0x88] sm:$0xff] %v857_v12  ;;  %v572_v25 = vshrl.u32 %v524_v15, 1  ;;  %v93_v27 = vadd.s32 %v63_v11, %v1094_v2  ;;  %v858_v28 = vmul.f32 %v810_v19, %v666_v13  ;;  %v94_v30 = vadd.s32 %v63_v11, %v1098_v4 }
  0x70   :  { %v573_v42 = vshrl.u32 %v525_v22, 1  ;;  %v478_v29 = vshrl.u32 %v430_v23, 16  ;;  %v859_v31 = vmul.f32 %v811_v24, %v667_v20  ;;  %v431_v32 = vmul.u32 3266489909, %v383_v26 }
  0x71   :  { %vm620_vm4 = vcmp.ge.s32.totalorder %v572_v25, 214748365  ;;  %v144_v33 = vadd.s32 %v1106_v7, %v93_v27  ;;  %906 = vst [vmem:[#allocation7 + $0x90] sm:$0xff] %v858_v28  ;;  %v145_v37 = vadd.s32 %v1106_v7, %v94_v30  ;;  %v95_v47 = vadd.s32 %v63_v11, %v1101_v5 }
  0x72   :  { %v973_v35 = vsel %vm620_vm4, 1.0, %v1057_v53  ;;  %vm621_vm5 = vcmp.ge.s32.totalorder %v573_v42, 214748365  ;;  %v526_v36 = vxor.u32 %v478_v29, %v430_v23  ;;  %907 = vst [vmem:[#allocation7 + $0x98] sm:$0xff] %v859_v31  ;;  %v479_v40 = vshrl.u32 %v431_v32, 16 }
  0x73   :  { %v812_v38 = vmul.f32 1.1111112, %v973_v35  ;;  %v974_v46 = vsel %vm621_vm5, 1.0, %v1057_v53  ;;  %v192_v16 = vshrl.u32 %v144_v33, 16  ;;  %v193_v44 = vshrl.u32 %v145_v37, 16 }
  0x74   :  { %v813_v41 = vmul.f32 1.1111112, %v974_v46  ;;  %v574_v43 = vshrl.u32 %v526_v36, 1  ;;  %v527_v10 = vxor.u32 %v479_v40, %v431_v32  ;;  %v96_v49 = vadd.s32 %v63_v11, %v1104_v6 }
  0x75   :  { %v860_v48 = vmul.f32 %v812_v38, %v668_v34  ;;  %v240_v39 = vxor.u32 %v192_v16, %v144_v33  ;;  %v241_v50 = vxor.u32 %v193_v44, %v145_v37  ;;  %v146_v51 = vadd.s32 %v1106_v7, %v95_v47 }
  0x76   :  { %v861_v17 = vmul.f32 %v813_v41, %v669_v45  ;;  %vm622_vm6 = vcmp.ge.s32.totalorder %v574_v43, 214748365  ;;  %v575_v54 = vshrl.u32 %v527_v10, 1  ;;  %v147_v56 = vadd.s32 %v1106_v7, %v96_v49 }
  0x77   :  { %908 = vst [vmem:[#allocation7 + $0xa0] sm:$0xff] %v860_v48  ;;  %v975_v18 = vsel %vm622_vm6, 1.0, %v1057_v53  ;;  %v288_v55 = vmul.u32 2246822507, %v240_v39  ;;  %v289_v58 = vmul.u32 2246822507, %v241_v50 }
  0x78   :  { %909 = vst [vmem:[#allocation7 + $0xa8] sm:$0xff] %v861_v17  ;;  %v814_v57 = vmul.f32 1.1111112, %v975_v18  ;;  %v194_v59 = vshrl.u32 %v146_v51, 16  ;;  %v33_v60 = vadd.s32 56, %v1092_v1  ;;  %v195_v62 = vshrl.u32 %v147_v56, 16 }
  0x79   :  { %vm623_vm7 = vcmp.ge.s32.totalorder %v575_v54, 214748365  ;;  %v336_v61 = vshrl.u32 %v288_v55, 13  ;;  %v34_v63 = vadd.s32 64, %v1092_v1  ;;  %v337_v9 = vshrl.u32 %v289_v58, 13 }
  0x7a   :  { %v862_v0 = vmul.f32 %v814_v57, %v670_v52  ;;  %v976_v8 = vsel %vm623_vm7, 1.0, %v1057_v53  ;;  %v242_v11 = vxor.u32 %v194_v59, %v146_v51  ;;  %v243_v14 = vxor.u32 %v195_v62, %v147_v56 }
  0x7b   :  { %v815_v12 = vmul.f32 1.1111112, %v976_v8  ;;  %v384_v13 = vxor.u32 %v336_v61, %v288_v55  ;;  %v64_v15 = vmul.u32 512, %v33_v60  ;;  %v385_v19 = vxor.u32 %v337_v9, %v289_v58  ;;  %v672_v55 = vld [vmem:[#allocation4 + $0xc0] sm:$0xff]  ;;  %v673_v60 = vld [vmem:[#allocation4 + $0xc8] sm:$0xff] }
  0x7c   :  { %910 = vst [vmem:[#allocation7 + $0xb0] sm:$0xff] %v862_v0  ;;  %v290_v20 = vmul.u32 2246822507, %v242_v11  ;;  %v1232_v21 = vmul.u32 512, %v34_v63  ;;  %v1235_v22 = vadd.s32 72, %v1092_v1 }
  0x7d   :  { %v863_v23 = vmul.f32 %v815_v12, %v671_v3  ;;  %v432_v24 = vmul.u32 3266489909, %v384_v13  ;;  %v291_v25 = vmul.u32 2246822507, %v243_v14  ;;  %v97_v26 = vadd.s32 %v64_v15, %v1094_v2 }
  0x7e   :  { %v433_v27 = vmul.u32 3266489909, %v385_v19  ;;  %v338_v28 = vshrl.u32 %v290_v20, 13  ;;  %v98_v42 = vadd.s32 %v64_v15, %v1098_v4  ;;  %v99_v29 = vadd.s32 %v64_v15, %v1101_v5  ;;  %v674_v19 = vld [vmem:[#allocation4 + $0xd0] sm:$0xff] }
  0x7f   :  { %911 = vst [vmem:[#allocation7 + $0xb8] sm:$0xff] %v863_v23  ;;  %v480_v30 = vshrl.u32 %v432_v24, 16  ;;  %v339_v31 = vshrl.u32 %v291_v25, 13  ;;  %v148_v32 = vadd.s32 %v1106_v7, %v97_v26  ;;  %v100_v33 = vadd.s32 %v64_v15, %v1104_v6 }
  0x80   :  { %v481_v34 = vshrl.u32 %v433_v27, 16  ;;  %v386_v35 = vxor.u32 %v338_v28, %v290_v20  ;;  %v149_v36 = vadd.s32 %v1106_v7, %v98_v42  ;;  %v150_v37 = vadd.s32 %v1106_v7, %v99_v29  ;;  %v675_v28 = vld [vmem:[#allocation4 + $0xd8] sm:$0xff] }
  0x81   :  { %v528_v38 = vxor.u32 %v480_v30, %v432_v24  ;;  %v387_v45 = vxor.u32 %v339_v31, %v291_v25  ;;  %v196_v46 = vshrl.u32 %v148_v32, 16  ;;  %v151_v40 = vadd.s32 %v1106_v7, %v100_v33 }
  0x82   :  { %v529_v16 = vxor.u32 %v481_v34, %v433_v27  ;;  %v434_v41 = vmul.u32 3266489909, %v386_v35  ;;  %v197_v43 = vshrl.u32 %v149_v36, 16  ;;  %v198_v44 = vshrl.u32 %v150_v37, 16 }
  0x83   :  { %v576_v47 = vshrl.u32 %v528_v38, 1  ;;  %v435_v48 = vmul.u32 3266489909, %v387_v45  ;;  %v244_v10 = vxor.u32 %v196_v46, %v148_v32  ;;  %v199_v39 = vshrl.u32 %v151_v40, 16 }
  0x84   :  { %v577_v49 = vshrl.u32 %v529_v16, 1  ;;  %v482_v17 = vshrl.u32 %v434_v41, 16  ;;  %v245_v50 = vxor.u32 %v197_v43, %v149_v36  ;;  %v246_v51 = vxor.u32 %v198_v44, %v150_v37 }
  0x85   :  { %vm624_vm8 = vcmp.ge.s32.totalorder %v576_v47, 214748365  ;;  %v483_v52 = vshrl.u32 %v435_v48, 16  ;;  %v292_v18 = vmul.u32 2246822507, %v244_v10  ;;  %v247_v54 = vxor.u32 %v199_v39, %v151_v40 }
  0x86   :  { %v977_v56 = vsel %vm624_vm8, 1.0, %v1057_v53  ;;  %vm625_vm9 = vcmp.ge.s32.totalorder %v577_v49, 214748365  ;;  %v530_v57 = vxor.u32 %v482_v17, %v434_v41  ;;  %v293_v58 = vmul.u32 2246822507, %v245_v50 }
  0x87   :  { %v816_v59 = vmul.f32 1.1111112, %v977_v56  ;;  %v978_v61 = vsel %vm625_vm9, 1.0, %v1057_v53  ;;  %v531_v62 = vxor.u32 %v483_v52, %v435_v48  ;;  %v340_v63 = vshrl.u32 %v292_v18, 13  ;;  %v676_v56 = vld [vmem:[#allocation4 + $0xe0] sm:$0xff] }
  0x88   :  { %v817_v0 = vmul.f32 1.1111112, %v978_v61  ;;  %v578_v3 = vshrl.u32 %v530_v57, 1  ;;  %v341_v8 = vshrl.u32 %v293_v58, 13  ;;  %v294_v9 = vmul.u32 2246822507, %v246_v51 }
  0x89   :  { %v864_v11 = vmul.f32 %v816_v59, %v672_v55  ;;  %v579_v12 = vshrl.u32 %v531_v62, 1  ;;  %v388_v13 = vxor.u32 %v340_v63, %v292_v18  ;;  %v295_v14 = vmul.u32 2246822507, %v247_v54 }
  0x8a   :  { %v865_v15 = vmul.f32 %v817_v0, %v673_v60  ;;  %vm626_vm10 = vcmp.ge.s32.totalorder %v578_v3, 214748365  ;;  %v389_v20 = vxor.u32 %v341_v8, %v293_v58  ;;  %v342_v23 = vshrl.u32 %v294_v9, 13  ;;  %v677_v58 = vld [vmem:[#allocation4 + $0xe8] sm:$0xff] }
  0x8b   :  { %912 = vst [vmem:[#allocation7 + $0xc0] sm:$0xff] %v864_v11  ;;  %v979_v24 = vsel %vm626_vm10, 1.0, %v1057_v53  ;;  %vm627_vm11 = vcmp.ge.s32.totalorder %v579_v12, 214748365  ;;  %v436_v25 = vmul.u32 3266489909, %v388_v13  ;;  %v101_v34 = vadd.s32 %v1232_v21, %v1094_v2 }
  0x8c   :  { %v343_v26 = vshrl.u32 %v295_v14, 13  ;;  %913 = vst [vmem:[#allocation7 + $0xc8] sm:$0xff] %v865_v15  ;;  %v818_v27 = vmul.f32 1.1111112, %v979_v24  ;;  %v980_v42 = vsel %vm627_vm11, 1.0, %v1057_v53  ;;  %v390_v30 = vxor.u32 %v342_v23, %v294_v9  ;;  %v678_v9 = vld [vmem:[#allocation4 + $0xf0] sm:$0xff] }
  0x8d   :  { %v437_v29 = vmul.u32 3266489909, %v389_v20  ;;  %v819_v31 = vmul.f32 1.1111112, %v980_v42  ;;  %v484_v32 = vshrl.u32 %v436_v25, 16  ;;  %v102_v38 = vadd.s32 %v1232_v21, %v1098_v4  ;;  %v679_v15 = vld [vmem:[#allocation4 + $0xf8] sm:$0xff] }
  0x8e   :  { %v391_v33 = vxor.u32 %v343_v26, %v295_v14  ;;  %v866_v35 = vmul.f32 %v818_v27, %v674_v19  ;;  %v438_v37 = vmul.u32 3266489909, %v390_v30  ;;  %v152_v16 = vadd.s32 %v1106_v7, %v101_v34 }
  0x8f   :  { %v485_v36 = vshrl.u32 %v437_v29, 16  ;;  %v867_v45 = vmul.f32 %v819_v31, %v675_v28  ;;  %v532_v46 = vxor.u32 %v484_v32, %v436_v25  ;;  %v153_v44 = vadd.s32 %v1106_v7, %v102_v38 }
  0x90   :  { %v439_v40 = vmul.u32 3266489909, %v391_v33  ;;  %914 = vst [vmem:[#allocation7 + $0xd0] sm:$0xff] %v866_v35  ;;  %v486_v43 = vshrl.u32 %v438_v37, 16  ;;  %v103_v47 = vadd.s32 %v1232_v21, %v1101_v5  ;;  %v200_v39 = vshrl.u32 %v152_v16, 16 }
  0x91   :  { %v533_v41 = vxor.u32 %v485_v36, %v437_v29  ;;  %915 = vst [vmem:[#allocation7 + $0xd8] sm:$0xff] %v867_v45  ;;  %v580_v48 = vshrl.u32 %v532_v46, 1  ;;  %v104_v49 = vadd.s32 %v1232_v21, %v1104_v6  ;;  %v201_v51 = vshrl.u32 %v153_v44, 16 }
  0x92   :  { %v487_v10 = vshrl.u32 %v439_v40, 16  ;;  %v534_v50 = vxor.u32 %v486_v43, %v438_v37  ;;  %v154_v52 = vadd.s32 %v1106_v7, %v103_v47  ;;  %v248_v54 = vxor.u32 %v200_v39, %v152_v16 }
  0x93   :  { %v581_v17 = vshrl.u32 %v533_v41, 1  ;;  %vm628_vm12 = vcmp.ge.s32.totalorder %v580_v48, 214748365  ;;  %v155_v55 = vadd.s32 %v1106_v7, %v104_v49  ;;  %v249_v60 = vxor.u32 %v201_v51, %v153_v44 }
  0x94   :  { %v535_v18 = vxor.u32 %v487_v10, %v439_v40  ;;  %v981_v57 = vsel %vm628_vm12, 1.0, %v1057_v53  ;;  %v582_v59 = vshrl.u32 %v534_v50, 1  ;;  %v296_v63 = vmul.u32 2246822507, %v248_v54 }
  0x95   :  { %vm629_vm13 = vcmp.ge.s32.totalorder %v581_v17, 214748365  ;;  %v820_v61 = vmul.f32 1.1111112, %v981_v57  ;;  %v297_v3 = vmul.u32 2246822507, %v249_v60 }
  0x96   :  { %v982_v21 = vsel %vm629_vm13, 1.0, %v1057_v53  ;;  %v583_v62 = vshrl.u32 %v535_v18, 1  ;;  %vm630_vm14 = vcmp.ge.s32.totalorder %v582_v59, 214748365  ;;  %v344_v12 = vshrl.u32 %v296_v63, 13 }
  0x97   :  { %v821_v0 = vmul.f32 1.1111112, %v982_v21  ;;  %v868_v8 = vmul.f32 %v820_v61, %v676_v56  ;;  %v983_v11 = vsel %vm630_vm14, 1.0, %v1057_v53  ;;  %v345_v20 = vshrl.u32 %v297_v3, 13 }
  0x98   :  { %vm631_vm15 = vcmp.ge.s32.totalorder %v583_v62, 214748365  ;;  %v822_v14 = vmul.f32 1.1111112, %v983_v11  ;;  %v392_v24 = vxor.u32 %v344_v12, %v296_v63  ;;  %v202_v25 = vshrl.u32 %v154_v52, 16 }
  0x99   :  { %v869_v13 = vmul.f32 %v821_v0, %v677_v58  ;;  %v984_v19 = vsel %vm631_vm15, 1.0, %v1057_v53  ;;  %916 = vst [vmem:[#allocation7 + $0xe0] sm:$0xff] %v868_v8  ;;  %v203_v26 = vshrl.u32 %v155_v55, 16  ;;  %v393_v28 = vxor.u32 %v345_v20, %v297_v3  ;;  %v681_v8 = vld [vmem:[#allocation4 + $0x108] sm:$0xff] }
  0x9a   :  { %v823_v23 = vmul.f32 1.1111112, %v984_v19  ;;  %v870_v27 = vmul.f32 %v822_v14, %v678_v9  ;;  %v66_v42 = vmul.u32 512, %v1235_v22  ;;  %v36_v29 = vadd.s32 80, %v1092_v1 }
  0x9b   :  { %917 = vst [vmem:[#allocation7 + $0xe8] sm:$0xff] %v869_v13  ;;  %v440_v31 = vmul.u32 3266489909, %v392_v24  ;;  %v250_v32 = vxor.u32 %v202_v25, %v154_v52  ;;  %v251_v33 = vxor.u32 %v203_v26, %v155_v55  ;;  %v441_v34 = vmul.u32 3266489909, %v393_v28  ;;  %v680_v55 = vld [vmem:[#allocation4 + $0x100] sm:$0xff] }
  0x9c   :  { %v871_v30 = vmul.f32 %v823_v23, %v679_v15  ;;  %918 = vst [vmem:[#allocation7 + $0xf0] sm:$0xff] %v870_v27  ;;  %v105_v35 = vadd.s32 %v66_v42, %v1094_v2  ;;  %v106_v36 = vadd.s32 %v66_v42, %v1098_v4  ;;  %v107_v37 = vadd.s32 %v66_v42, %v1101_v5 }
  0x9d   :  { %v488_v38 = vshrl.u32 %v440_v31, 16  ;;  %v298_v45 = vmul.u32 2246822507, %v250_v32  ;;  %v299_v46 = vmul.u32 2246822507, %v251_v33  ;;  %v108_v22 = vadd.s32 %v66_v42, %v1104_v6 }
  0x9e   :  { %919 = vst [vmem:[#allocation7 + $0xf8] sm:$0xff] %v871_v30  ;;  %v489_v40 = vshrl.u32 %v441_v34, 16  ;;  %v156_v16 = vadd.s32 %v1106_v7, %v105_v35  ;;  %v157_v41 = vadd.s32 %v1106_v7, %v106_v36  ;;  %v158_v43 = vadd.s32 %v1106_v7, %v107_v37  ;;  %v682_v37 = vld [vmem:[#allocation4 + $0x110] sm:$0xff] }
  0x9f   :  { %v536_v44 = vxor.u32 %v488_v38, %v440_v31  ;;  %v346_v47 = vshrl.u32 %v298_v45, 13  ;;  %v347_v48 = vshrl.u32 %v299_v46, 13  ;;  %v159_v10 = vadd.s32 %v1106_v7, %v108_v22  ;;  %v683_v22 = vld [vmem:[#allocation4 + $0x118] sm:$0xff] }
  0xa0   :  { %v537_v39 = vxor.u32 %v489_v40, %v441_v34  ;;  %v204_v49 = vshrl.u32 %v156_v16, 16  ;;  %v205_v17 = vshrl.u32 %v157_v41, 16  ;;  %v206_v50 = vshrl.u32 %v158_v43, 16 }
  0xa1   :  { %v584_v51 = vshrl.u32 %v536_v44, 1  ;;  %v394_v52 = vxor.u32 %v346_v47, %v298_v45  ;;  %v395_v18 = vxor.u32 %v347_v48, %v299_v46  ;;  %v207_v54 = vshrl.u32 %v159_v10, 16 }
  0xa2   :  { %v585_v56 = vshrl.u32 %v537_v39, 1  ;;  %v252_v57 = vxor.u32 %v204_v49, %v156_v16  ;;  %v253_v58 = vxor.u32 %v205_v17, %v157_v41  ;;  %v254_v59 = vxor.u32 %v206_v50, %v158_v43 }
  0xa3   :  { %vm632_vm0 = vcmp.ge.s32.totalorder %v584_v51, 214748365  ;;  %v442_v60 = vmul.u32 3266489909, %v394_v52  ;;  %v443_v61 = vmul.u32 3266489909, %v395_v18  ;;  %v255_v21 = vxor.u32 %v207_v54, %v159_v10 }
  0xa4   :  { %v985_v62 = vsel %vm632_vm0, 1.0, %v1057_v53  ;;  %vm633_vm1 = vcmp.ge.s32.totalorder %v585_v56, 214748365  ;;  %v300_v63 = vmul.u32 2246822507, %v252_v57  ;;  %v67_v0 = vmul.u32 512, %v36_v29 }
  0xa5   :  { %v824_v3 = vmul.f32 1.1111112, %v985_v62  ;;  %v986_v9 = vsel %vm633_vm1, 1.0, %v1057_v53  ;;  %v490_v11 = vshrl.u32 %v442_v60, 16  ;;  %v491_v12 = vshrl.u32 %v443_v61, 16 }
  0xa6   :  { %v825_v13 = vmul.f32 1.1111112, %v986_v9  ;;  %v348_v14 = vshrl.u32 %v300_v63, 13  ;;  %v301_v15 = vmul.u32 2246822507, %v253_v58  ;;  %v109_v19 = vadd.s32 %v67_v0, %v1094_v2 }
  0xa7   :  { %v872_v20 = vmul.f32 %v824_v3, %v680_v55  ;;  %v538_v23 = vxor.u32 %v490_v11, %v442_v60  ;;  %v539_v24 = vxor.u32 %v491_v12, %v443_v61  ;;  %v302_v25 = vmul.u32 2246822507, %v254_v59  ;;  %v684_v3 = vld [vmem:[#allocation4 + $0x120] sm:$0xff] }
  0xa8   :  { %v873_v26 = vmul.f32 %v825_v13, %v681_v8  ;;  %v396_v27 = vxor.u32 %v348_v14, %v300_v63  ;;  %v349_v28 = vshrl.u32 %v301_v15, 13  ;;  %v303_v42 = vmul.u32 2246822507, %v255_v21 }
  0xa9   :  { %920 = vst [vmem:[#allocation7 + $0x100] sm:$0xff] %v872_v20  ;;  %v586_v29 = vshrl.u32 %v538_v23, 1  ;;  %v587_v30 = vshrl.u32 %v539_v24, 1  ;;  %v350_v31 = vshrl.u32 %v302_v25, 13  ;;  %v160_v32 = vadd.s32 %v1106_v7, %v109_v19  ;;  %v685_v19 = vld [vmem:[#allocation4 + $0x128] sm:$0xff] }
  0xaa   :  { %921 = vst [vmem:[#allocation7 + $0x108] sm:$0xff] %v873_v26  ;;  %v444_v33 = vmul.u32 3266489909, %v396_v27  ;;  %v397_v34 = vxor.u32 %v349_v28, %v301_v15  ;;  %v351_v35 = vshrl.u32 %v303_v42, 13  ;;  %v110_v36 = vadd.s32 %v67_v0, %v1098_v4  ;;  %v686_v26 = vld [vmem:[#allocation4 + $0x130] sm:$0xff] }
  0xab   :  { %vm634_vm2 = vcmp.ge.s32.totalorder %v586_v29, 214748365  ;;  %vm635_vm3 = vcmp.ge.s32.totalorder %v587_v30, 214748365  ;;  %v398_v38 = vxor.u32 %v350_v31, %v302_v25  ;;  %v208_v45 = vshrl.u32 %v160_v32, 16 }
  0xac   :  { %v987_v46 = vsel %vm634_vm2, 1.0, %v1057_v53  ;;  %v988_v40 = vsel %vm635_vm3, 1.0, %v1057_v53  ;;  %v492_v16 = vshrl.u32 %v444_v33, 16  ;;  %v445_v41 = vmul.u32 3266489909, %v397_v34 }
  0xad   :  { %v826_v43 = vmul.f32 1.1111112, %v987_v46  ;;  %v827_v44 = vmul.f32 1.1111112, %v988_v40  ;;  %v446_v47 = vmul.u32 3266489909, %v398_v38  ;;  %v399_v48 = vxor.u32 %v351_v35, %v303_v42 }
  0xae   :  { %v540_v10 = vxor.u32 %v492_v16, %v444_v33  ;;  %v493_v39 = vshrl.u32 %v445_v41, 16  ;;  %v256_v49 = vxor.u32 %v208_v45, %v160_v32  ;;  %v161_v17 = vadd.s32 %v1106_v7, %v110_v36  ;;  %v687_v32 = vld [vmem:[#allocation4 + $0x138] sm:$0xff] }
  0xaf   :  { %v874_v50 = vmul.f32 %v826_v43, %v682_v37  ;;  %v875_v51 = vmul.f32 %v827_v44, %v683_v22  ;;  %v494_v52 = vshrl.u32 %v446_v47, 16  ;;  %v447_v18 = vmul.u32 3266489909, %v399_v48 }
  0xb0   :  { %v588_v54 = vshrl.u32 %v540_v10, 1  ;;  %v541_v55 = vxor.u32 %v493_v39, %v445_v41  ;;  %v304_v56 = vmul.u32 2246822507, %v256_v49  ;;  %v209_v57 = vshrl.u32 %v161_v17, 16 }
  0xb1   :  { %922 = vst [vmem:[#allocation7 + $0x110] sm:$0xff] %v874_v50  ;;  %923 = vst [vmem:[#allocation7 + $0x118] sm:$0xff] %v875_v51  ;;  %v542_v58 = vxor.u32 %v494_v52, %v446_v47  ;;  %v495_v59 = vshrl.u32 %v447_v18, 16  ;;  %v111_v60 = vadd.s32 %v67_v0, %v1101_v5  ;;  %v112_v61 = vadd.s32 %v67_v0, %v1104_v6  ;;  %v688_v51 = vld [vmem:[#allocation4 + $0x140] sm:$0xff] }
  0xb2   :  { %vm636_vm4 = vcmp.ge.s32.totalorder %v588_v54, 214748365  ;;  %v589_v21 = vshrl.u32 %v541_v55, 1  ;;  %v352_v62 = vshrl.u32 %v304_v56, 13  ;;  %v257_v63 = vxor.u32 %v209_v57, %v161_v17 }
  0xb3   :  { %v989_v8 = vsel %vm636_vm4, 1.0, %v1057_v53  ;;  %v590_v9 = vshrl.u32 %v542_v58, 1  ;;  %v543_v11 = vxor.u32 %v495_v59, %v447_v18  ;;  %v162_v12 = vadd.s32 %v1106_v7, %v111_v60 }
  0xb4   :  { %v828_v13 = vmul.f32 1.1111112, %v989_v8  ;;  %vm637_vm5 = vcmp.ge.s32.totalorder %v589_v21, 214748365  ;;  %v400_v14 = vxor.u32 %v352_v62, %v304_v56  ;;  %v305_v15 = vmul.u32 2246822507, %v257_v63 }
  0xb5   :  { %v990_v20 = vsel %vm637_vm5, 1.0, %v1057_v53  ;;  %vm638_vm6 = vcmp.ge.s32.totalorder %v590_v9, 214748365  ;;  %v591_v0 = vshrl.u32 %v543_v11, 1  ;;  %v210_v23 = vshrl.u32 %v162_v12, 16  ;;  %v689_v9 = vld [vmem:[#allocation4 + $0x148] sm:$0xff] }
  0xb6   :  { %v876_v24 = vmul.f32 %v828_v13, %v684_v3  ;;  %v829_v25 = vmul.f32 1.1111112, %v990_v20  ;;  %v991_v27 = vsel %vm638_vm6, 1.0, %v1057_v53  ;;  %v448_v28 = vmul.u32 3266489909, %v400_v14 }
  0xb7   :  { %v830_v42 = vmul.f32 1.1111112, %v991_v27  ;;  %vm639_vm7 = vcmp.ge.s32.totalorder %v591_v0, 214748365  ;;  %v353_v29 = vshrl.u32 %v305_v15, 13  ;;  %v258_v30 = vxor.u32 %v210_v23, %v162_v12 }
  0xb8   :  { %924 = vst [vmem:[#allocation7 + $0x120] sm:$0xff] %v876_v24  ;;  %v877_v31 = vmul.f32 %v829_v25, %v685_v19  ;;  %v992_v33 = vsel %vm639_vm7, 1.0, %v1057_v53  ;;  %v496_v34 = vshrl.u32 %v448_v28, 16  ;;  %v163_v35 = vadd.s32 %v1106_v7, %v112_v61 }
  0xb9   :  { %v878_v36 = vmul.f32 %v830_v42, %v686_v26  ;;  %v831_v37 = vmul.f32 1.1111112, %v992_v33  ;;  %v401_v38 = vxor.u32 %v353_v29, %v305_v15  ;;  %v306_v45 = vmul.u32 2246822507, %v258_v30 }
  0xba   :  { %925 = vst [vmem:[#allocation7 + $0x128] sm:$0xff] %v877_v31  ;;  %v544_v46 = vxor.u32 %v496_v34, %v448_v28  ;;  %v211_v22 = vshrl.u32 %v163_v35, 16  ;;  %v37_v40 = vadd.s32 88, %v1092_v1  ;;  %v690_v28 = vld [vmem:[#allocation4 + $0x150] sm:$0xff] }
  0xbb   :  { %926 = vst [vmem:[#allocation7 + $0x130] sm:$0xff] %v878_v36  ;;  %v879_v16 = vmul.f32 %v831_v37, %v687_v32  ;;  %v449_v41 = vmul.u32 3266489909, %v401_v38  ;;  %v354_v43 = vshrl.u32 %v306_v45, 13 }
  0xbc   :  { %v592_v44 = vshrl.u32 %v544_v46, 1  ;;  %v259_v47 = vxor.u32 %v211_v22, %v163_v35  ;;  %v68_v48 = vmul.u32 512, %v37_v40  ;;  %v691_v40 = vld [vmem:[#allocation4 + $0x158] sm:$0xff] }
  0xbd   :  { %927 = vst [vmem:[#allocation7 + $0x138] sm:$0xff] %v879_v16  ;;  %v497_v10 = vshrl.u32 %v449_v41, 16  ;;  %v402_v39 = vxor.u32 %v354_v43, %v306_v45 }
  0xbe   :  { %vm640_vm8 = vcmp.ge.s32.totalorder %v592_v44, 214748365  ;;  %v307_v49 = vmul.u32 2246822507, %v259_v47  ;;  %v113_v17 = vadd.s32 %v68_v48, %v1094_v2  ;;  %v114_v50 = vadd.s32 %v68_v48, %v1098_v4 }
  0xbf   :  { %v993_v52 = vsel %vm640_vm8, 1.0, %v1057_v53  ;;  %v545_v1 = vxor.u32 %v497_v10, %v449_v41  ;;  %v450_v18 = vmul.u32 3266489909, %v402_v39  ;;  %v115_v54 = vadd.s32 %v68_v48, %v1101_v5 }
  0xc0   :  { %v832_v55 = vmul.f32 1.1111112, %v993_v52  ;;  %v355_v56 = vshrl.u32 %v307_v49, 13  ;;  %v164_v57 = vadd.s32 %v1106_v7, %v113_v17  ;;  %v165_v58 = vadd.s32 %v1106_v7, %v114_v50 }
  0xc1   :  { %v593_v59 = vshrl.u32 %v545_v1, 1  ;;  %v498_v60 = vshrl.u32 %v450_v18, 16  ;;  %v166_v61 = vadd.s32 %v1106_v7, %v115_v54  ;;  %v116_v2 = vadd.s32 %v68_v48, %v1104_v6 }
  0xc2   :  { %v880_v4 = vmul.f32 %v832_v55, %v688_v51  ;;  %v403_v21 = vxor.u32 %v355_v56, %v307_v49  ;;  %v212_v62 = vshrl.u32 %v164_v57, 16  ;;  %v213_v63 = vshrl.u32 %v165_v58, 16  ;;  %v692_v56 = vld [vmem:[#allocation4 + $0x160] sm:$0xff] }
  0xc3   :  { %vm641_vm9 = vcmp.ge.s32.totalorder %v593_v59, 214748365  ;;  %v546_v3 = vxor.u32 %v498_v60, %v450_v18  ;;  %v214_v8 = vshrl.u32 %v166_v61, 16  ;;  %v167_v5 = vadd.s32 %v1106_v7, %v116_v2 }
  0xc4   :  { %928 = vst [vmem:[#allocation7 + $0x140] sm:$0xff] %v880_v4  ;;  %v994_v11 = vsel %vm641_vm9, 1.0, %v1057_v53  ;;  %v451_v12 = vmul.u32 3266489909, %v403_v21  ;;  %v260_v13 = vxor.u32 %v212_v62, %v164_v57  ;;  %v261_v14 = vxor.u32 %v213_v63, %v165_v58  ;;  %v693_v57 = vld [vmem:[#allocation4 + $0x168] sm:$0xff]  ;;  %v694_v4 = vld [vmem:[#allocation4 + $0x170] sm:$0xff] }
  0xc5   :  { %v833_v15 = vmul.f32 1.1111112, %v994_v11  ;;  %v594_v19 = vshrl.u32 %v546_v3, 1  ;;  %v262_v20 = vxor.u32 %v214_v8, %v166_v61  ;;  %v215_v6 = vshrl.u32 %v167_v5, 16  ;;  %v695_v8 = vld [vmem:[#allocation4 + $0x178] sm:$0xff] }
  0xc6   :  { %v499_v0 = vshrl.u32 %v451_v12, 16  ;;  %v308_v23 = vmul.u32 2246822507, %v260_v13  ;;  %v309_v24 = vmul.u32 2246822507, %v261_v14 }
  0xc7   :  { %v881_v25 = vmul.f32 %v833_v15, %v689_v9  ;;  %vm642_vm10 = vcmp.ge.s32.totalorder %v594_v19, 214748365  ;;  %v310_v26 = vmul.u32 2246822507, %v262_v20  ;;  %v263_v27 = vxor.u32 %v215_v6, %v167_v5 }
  0xc8   :  { %v995_v7 = vsel %vm642_vm10, 1.0, %v1057_v53  ;;  %v547_v42 = vxor.u32 %v499_v0, %v451_v12  ;;  %v356_v29 = vshrl.u32 %v308_v23, 13  ;;  %v357_v30 = vshrl.u32 %v309_v24, 13 }
  0xc9   :  { %929 = vst [vmem:[#allocation7 + $0x148] sm:$0xff] %v881_v25  ;;  %v834_v31 = vmul.f32 1.1111112, %v995_v7  ;;  %v358_v32 = vshrl.u32 %v310_v26, 13  ;;  %v311_v33 = vmul.u32 2246822507, %v263_v27 }
  0xca   :  { %v595_v34 = vshrl.u32 %v547_v42, 1  ;;  %v404_v35 = vxor.u32 %v356_v29, %v308_v23  ;;  %v405_v36 = vxor.u32 %v357_v30, %v309_v24 }
  0xcb   :  { %v882_v37 = vmul.f32 %v834_v31, %v690_v28  ;;  %v406_v38 = vxor.u32 %v358_v32, %v310_v26  ;;  %v359_v45 = vshrl.u32 %v311_v33, 13 }
  0xcc   :  { %vm643_vm11 = vcmp.ge.s32.totalorder %v595_v34, 214748365  ;;  %v452_v46 = vmul.u32 3266489909, %v404_v35  ;;  %v453_v22 = vmul.u32 3266489909, %v405_v36 }
  0xcd   :  { %930 = vst [vmem:[#allocation7 + $0x150] sm:$0xff] %v882_v37  ;;  %v996_v16 = vsel %vm643_vm11, 1.0, %v1057_v53  ;;  %v454_v41 = vmul.u32 3266489909, %v406_v38  ;;  %v407_v43 = vxor.u32 %v359_v45, %v311_v33 }
  0xce   :  { %v835_v44 = vmul.f32 1.1111112, %v996_v16  ;;  %v500_v47 = vshrl.u32 %v452_v46, 16  ;;  %v501_v48 = vshrl.u32 %v453_v22, 16 }
  0xcf   :  { %v502_v10 = vshrl.u32 %v454_v41, 16  ;;  %v455_v39 = vmul.u32 3266489909, %v407_v43 }
  0xd0   :  { %v883_v49 = vmul.f32 %v835_v44, %v691_v40  ;;  %v548_v17 = vxor.u32 %v500_v47, %v452_v46  ;;  %v549_v50 = vxor.u32 %v501_v48, %v453_v22 }
  0xd1   :  { %v550_v51 = vxor.u32 %v502_v10, %v454_v41  ;;  %v503_v52 = vshrl.u32 %v455_v39, 16 }
  0xd2   :  { %931 = vst [vmem:[#allocation7 + $0x158] sm:$0xff] %v883_v49  ;;  %v596_v1 = vshrl.u32 %v548_v17, 1  ;;  %v597_v18 = vshrl.u32 %v549_v50, 1 }
  0xd3   :  { %v598_v54 = vshrl.u32 %v550_v51, 1  ;;  %v551_v55 = vxor.u32 %v503_v52, %v455_v39 }
  0xd4   :  { %vm644_vm12 = vcmp.ge.s32.totalorder %v596_v1, 214748365  ;;  %vm645_vm13 = vcmp.ge.s32.totalorder %v597_v18, 214748365 }
  0xd5   :  { %v997_v58 = vsel %vm644_vm12, 1.0, %v1057_v53  ;;  %v998_v59 = vsel %vm645_vm13, 1.0, %v1057_v53  ;;  %vm646_vm14 = vcmp.ge.s32.totalorder %v598_v54, 214748365  ;;  %v599_v60 = vshrl.u32 %v551_v55, 1 }
  0xd6   :  { %v836_v61 = vmul.f32 1.1111112, %v997_v58  ;;  %v837_v2 = vmul.f32 1.1111112, %v998_v59  ;;  %v999_v21 = vsel %vm646_vm14, 1.0, %v1057_v53 }
  0xd7   :  { %v838_v62 = vmul.f32 1.1111112, %v999_v21  ;;  %vm647_vm15 = vcmp.ge.s32.totalorder %v599_v60, 214748365 }
  0xd8   :  { %v884_v63 = vmul.f32 %v836_v61, %v692_v56  ;;  %v885_v3 = vmul.f32 %v837_v2, %v693_v57  ;;  %v1000_v5 = vsel %vm647_vm15, 1.0, %v1057_v53 }
  0xd9   :  { %v886_v9 = vmul.f32 %v838_v62, %v694_v4  ;;  %v839_v11 = vmul.f32 1.1111112, %v1000_v5 }
  0xda   :  { %932 = vst [vmem:[#allocation7 + $0x160] sm:$0xff] %v884_v63  ;;  %933 = vst [vmem:[#allocation7 + $0x168] sm:$0xff] %v885_v3 }
  0xdb   :  { %934 = vst [vmem:[#allocation7 + $0x170] sm:$0xff] %v886_v9  ;;  %v887_v12 = vmul.f32 %v839_v11, %v695_v8 }
  0xdd   :  { %935 = vst [vmem:[#allocation7 + $0x178] sm:$0xff] %v887_v12 }
  0xde   :  { %1039 = shalt.err (!%p1036_p12)
}
  0xdf   :  { %s1040_s29 = scalar_lea.hbm %s1325_s2, 6144 }
  0xe0   :  { %p1041_p13 = scmp.ne.s32.totalorder %s1325_s2, %s1040_s29  ;;  %p1044_p0 = scmp.lt.u32.totalorder %s1040_s29, %s1325_s2 }
  0xe2   :  { %p1046_p1 = pnand %p1044_p0, %p1041_p13 }
  0xe4   :  { %1049 = shalt.err (!%p1046_p1)
}
  0xe5   :  { %947 = dma.vmem_to_hbm [thread:$0]  %s942_s1, 6144, %s1325_s2, [#allocation6], %s1055_s19, %s1055_s19, %s1056_s20  }
  0xe6   :  { %1052 = dma.done.wait [#allocation6], 6144  }
  0xe7   :  { %1053 = vsyncadd [#allocation6], 4294961152 }
  0xe8   :  { %951 = vsyncpa [#allocation5], 1 }
  0xe9   :  { %952 = vsyncpa [#allocation6], 1 }

</bundles_post_ra>
